<compile_context>
chip_gen: v7x
topology: tpu7x:2x2x1
jax: 0.10.0
libtpu: 0.0.40
codegen_flags: <defaults>
</compile_context>

<pallas_src>
import jax
import jax.numpy as jnp
from jax.experimental import pallas as pl
from jax.experimental.pallas import tpu as pltpu


def _make_ibot_loss_kernel(student_temp: float):
    inv_temp = 1.0 / float(student_temp)

    def kernel(s_ref, t_ref, m_ref, out_ref):
        # s_ref/t_ref block: (1, block_n, D) wire dtype; m_ref: (1, block_n, 1) f32
        # out_ref block: (1, 1, 2) f32, resident across the token-tile axis.
        n = pl.program_id(1)

        @pl.when(n == 0)
        def _init():
            out_ref[...] = jnp.zeros_like(out_ref)

        s_raw = s_ref[0]                                   # (bn, D) wire dtype
        t_raw = t_ref[0]                                   # (bn, D) wire dtype

        # Row max on the raw dtype (max is exact); only the (bn, 1) column is upcast.
        row_max = jnp.max(s_raw, axis=-1, keepdims=True).astype(jnp.float32)

        # z = (s - max) / temp : one f32 pass, no scaled copy of s ever live, z <= 0.
        z = (s_raw.astype(jnp.float32) - row_max) * inv_temp          # (bn, D) f32

        # log-sum-exp over the lane axis (EUP exp + XLU reduce).
        lse = jnp.log(jnp.sum(jnp.exp(z), axis=-1, keepdims=True))    # (bn, 1)

        # sum_d t on the otherwise-idle MXU (ones-column matvec, f32 accumulate).
        ones_col = jnp.ones((t_raw.shape[-1], 1), dtype=t_raw.dtype)
        t_sum = jnp.dot(t_raw, ones_col,
                        preferred_element_type=jnp.float32)           # (bn, 1)

        # sum_d t*z (cast fuses into the multiply; lane reduce on XLU).
        t_dot_z = jnp.sum(t_raw.astype(jnp.float32) * z,
                          axis=-1, keepdims=True)                      # (bn, 1)

        # sum_d t * log_softmax(s/temp) = sum_d t*z - lse * sum_d t
        per_token = t_dot_z - lse * t_sum                              # (bn, 1)

        mask_col = m_ref[0]                                            # (bn, 1) f32
        num_tile = jnp.sum(per_token * mask_col, axis=0, keepdims=True)  # (1, 1)
        den_tile = jnp.sum(mask_col, axis=0, keepdims=True)              # (1, 1)

        # Accumulate into the resident output block (HBM writeback once per b).
        out_ref[0, :, 0:1] += num_tile
        out_ref[0, :, 1:2] += den_tile

    return kernel


def _vmem_capacity_bytes() -> int:
    """Physical per-core VMEM (v5e/v6e: 128 MiB, v7x: 64 MiB); conservative fallback."""
    try:
        cap = int(pltpu.get_tpu_info().vmem_capacity_bytes)
        if cap > 0:
            return cap
    except Exception:
        pass
    return 64 * 1024 * 1024


def _choose_block_n(N: int, D: int, s_itemsize: int, t_itemsize: int,
                    tile_budget_bytes: int) -> int:
    """Largest token tile whose pipelined inputs + live f32 temps fit the budget."""
    # Per token row:
    #   * 2 pipeline buffers for each of the two token inputs at wire dtype,
    #   * ~4 concurrently-live (block_n, D) f32 temporaries inside the body
    #     (z, exp/product slabs, upcast teacher) at 16 B/elem,
    #   * column temps / mask are negligible (small constant).
    per_row = D * (2 * (s_itemsize + t_itemsize) + 16) + 64
    max_tn = int(max(1, tile_budget_bytes // per_row))
    if max_tn >= N:
        return N
    best_any = None
    for tn in range(min(max_tn, N), 0, -1):
        if N % tn == 0:
            if tn % 8 == 0:
                return tn                  # sublane-aligned divisor of N
            if best_any is None:
                best_any = tn
    return best_any if best_any is not None else N


def ibot_patch_loss_forward(student_patch_tokens,
                            teacher_patch_tokens,
                            student_masks_flat,
                            student_temp: float = 0.1,
                            block_n: int | None = None,
                            vmem_limit_bytes: int | None = None):
    """Pallas implementation of iBOTPatchLoss.forward.

    Args:
      student_patch_tokens: (B, N, D) float (bf16 recommended on the wire).
      teacher_patch_tokens: (B, N, D) float (bf16 recommended on the wire).
      student_masks_flat:   (B, N) bool or float.
      student_temp: student temperature.
      block_n: token-tile size (auto-chosen from a per-generation VMEM budget if None).
      vmem_limit_bytes: scoped VMEM request (auto: ~55% of physical per-core VMEM).

    Returns:
      scalar loss (float32).
    """
    B, N, D = student_patch_tokens.shape
    s_bytes = jnp.dtype(student_patch_tokens.dtype).itemsize
    t_bytes = jnp.dtype(teacher_patch_tokens.dtype).itemsize

    # Generation-aware VMEM budget (v7x has only 64 MiB/TC vs 128 MiB on v5e/v6e).
    vmem_cap = _vmem_capacity_bytes()
    if vmem_limit_bytes is None:
        vmem_limit_bytes = int(0.55 * vmem_cap)
    if block_n is None:
        block_n = _choose_block_n(N, D, s_bytes, t_bytes,
                                  tile_budget_bytes=int(0.75 * vmem_limit_bytes))
    assert N % block_n == 0, (N, block_n)
    nt = N // block_n

    # Mask as an f32 column (B, N, 1): O(B*N) traffic, < 1% of the O(B*N*D)
    # token traffic, and the (1, block_n, 1) block is always layout-legal.
    mask3 = student_masks_flat.astype(jnp.float32).reshape(B, N, 1)

    grid_spec = pltpu.PrefetchScalarGridSpec(
        num_scalar_prefetch=0,
        grid=(B, nt),
        in_specs=[
            pl.BlockSpec((1, block_n, D), lambda b, n: (b, n, 0)),
            pl.BlockSpec((1, block_n, D), lambda b, n: (b, n, 0)),
            pl.BlockSpec((1, block_n, 1), lambda b, n: (b, n, 0)),
        ],
        # Same block for every n -> resident accumulator, one HBM write per b.
        out_specs=pl.BlockSpec((1, 1, 2), lambda b, n: (b, 0, 0)),
    )

    cost = pl.CostEstimate(
        flops=7 * B * N * D,
        transcendentals=B * N * D,
        bytes_accessed=B * N * D * (s_bytes + t_bytes) + B * N * 4 + B * 2 * 4,
    )

    sums = pl.pallas_call(
        _make_ibot_loss_kernel(student_temp),
        out_shape=jax.ShapeDtypeStruct((B, 1, 2), jnp.float32),
        grid_spec=grid_spec,
        compiler_params=pltpu.CompilerParams(
            dimension_semantics=("parallel", "arbitrary"),
            vmem_limit_bytes=int(vmem_limit_bytes),
        ),
        cost_estimate=cost,
    )(student_patch_tokens, teacher_patch_tokens, mask3)

    # Tiny final reduction (glue): per-batch divide with clamp(min=1.0), -mean over B.
    num_b = sums[:, 0, 0]
    den_b = jnp.maximum(sums[:, 0, 1], 1.0)
    return -jnp.mean(num_b / den_b)


def _reference_forward(s, t, mask, student_temp=0.1):
    s = s.astype(jnp.float32)
    t = t.astype(jnp.float32)
    logp = jax.nn.log_softmax(s / student_temp, axis=-1)
    loss = jnp.sum(t * logp, axis=-1)                      # (B, N)
    m = mask.astype(jnp.float32)
    loss = jnp.sum(loss * m, axis=-1) / jnp.maximum(jnp.sum(m, axis=-1), 1.0)
    return -jnp.mean(loss)


if __name__ == "__main__":
    # Small deterministic shapes consistent with the module's forward():
    # batch=2, seq(N)=16 patch tokens, patch_out_dim(D)=128 (lane-aligned).
    B, N, D = 2, 16, 128
    key = jax.random.PRNGKey(0)
    k1, k2, k3 = jax.random.split(key, 3)

    # bf16 on the HBM wire (kernel does f32 math internally); the teacher is a
    # probability-like target (softmax of random logits), deterministic/synthetic.
    student = jax.random.normal(k1, (B, N, D), dtype=jnp.float32).astype(jnp.bfloat16)
    teacher = jax.nn.softmax(
        jax.random.normal(k2, (B, N, D), dtype=jnp.float32), axis=-1
    ).astype(jnp.bfloat16)
    masks = jax.random.bernoulli(k3, p=0.5, shape=(B, N))

    out = ibot_patch_loss_forward(student, teacher, masks, student_temp=0.1)
    out = jax.block_until_ready(out)

    ref = _reference_forward(student, teacher, masks, student_temp=0.1)
    assert jnp.allclose(out, ref, atol=2e-4, rtol=2e-4), (out, ref)

    # TODO(synk): softmax_center_teacher / sinkhorn_knopp_teacher / center EMA update
    # depend on torch.distributed all_reduce state and are not part of forward(); not ported.
    print("KERNEL_OK")
</pallas_src>

<mosaic_0001>
module attributes {stable_mosaic.version = 11 : i64} {
  func.func @kernel(%arg0: i32, %arg1: i32, %arg2: memref<1x16x128xbf16, #tpu.memory_space<vmem>>, %arg3: memref<1x16x128xbf16, #tpu.memory_space<vmem>>, %arg4: memref<1x16x1xf32, #tpu.memory_space<vmem>>, %arg5: memref<1x1x2xf32, #tpu.memory_space<vmem>>) attributes {dimension_semantics = [#tpu.dimension_semantics<parallel>, #tpu.dimension_semantics<arbitrary>], iteration_bounds = array<i64: 2, 1>, scalar_prefetch = 0 : i64, scratch_operands = 0 : i64, tpu.core_type = #tpu.core_type<tc>, window_params = [{transform_indices = @transform_0, window_bounds = array<i64: 1, 16, 128>}, {transform_indices = @transform_1, window_bounds = array<i64: 1, 16, 128>}, {transform_indices = @transform_2, window_bounds = array<i64: 1, 16, 1>}, {transform_indices = @transform_3, window_bounds = array<i64: 1, 1, 2>}]} {
    %c0_i32 = arith.constant 0 : i32
    %0 = arith.cmpi eq, %arg1, %c0_i32 : i32
    %1 = arith.extui %0 : i1 to i32
    %c0_i32_0 = arith.constant 0 : i32
    %2 = arith.cmpi ne, %1, %c0_i32_0 : i32
    scf.if %2 {
      %cst_27 = arith.constant 0.000000e+00 : f32
      %46 = vector.broadcast %cst_27 : f32 to vector<1x1x2xf32>
      %c0_28 = arith.constant 0 : index
      %c0_29 = arith.constant 0 : index
      %c0_30 = arith.constant 0 : index
      %47 = vector.load %arg5[%c0_28, %c0_29, %c0_30] : memref<1x1x2xf32, #tpu.memory_space<vmem>>, vector<1x1x2xf32>
      tpu.vector_store %arg5[%c0_28, %c0_29, %c0_30], %46 {strides = array<i32>} : memref<1x1x2xf32, #tpu.memory_space<vmem>>, vector<1x1x2xf32>,
    } else {
    }
    %c0 = arith.constant 0 : index
    %c0_1 = arith.constant 0 : index
    %c0_2 = arith.constant 0 : index
    %3 = vector.load %arg2[%c0, %c0_1, %c0_2] : memref<1x16x128xbf16, #tpu.memory_space<vmem>>, vector<1x16x128xbf16>
    %4 = vector.shape_cast %3 : vector<1x16x128xbf16> to vector<16x128xbf16>
    %c0_3 = arith.constant 0 : index
    %c0_4 = arith.constant 0 : index
    %c0_5 = arith.constant 0 : index
    %5 = vector.load %arg3[%c0_3, %c0_4, %c0_5] : memref<1x16x128xbf16, #tpu.memory_space<vmem>>, vector<1x16x128xbf16>
    %6 = vector.shape_cast %5 : vector<1x16x128xbf16> to vector<16x128xbf16>
    %cst = arith.constant dense<0xFF80> : vector<16xbf16>
    %7 = vector.multi_reduction <maximumf>, %4, %cst [1] : vector<16x128xbf16> to vector<16xbf16>
    %8 = vector.shape_cast %7 : vector<16xbf16> to vector<16x1xbf16>
    %9 = arith.extf %8 : vector<16x1xbf16> to vector<16x1xf32>
    %10 = arith.extf %4 : vector<16x128xbf16> to vector<16x128xf32>
    %11 = vector.broadcast %9 : vector<16x1xf32> to vector<16x128xf32>
    %12 = arith.subf %10, %11 : vector<16x128xf32>
    %cst_6 = arith.constant 1.000000e+01 : f32
    %13 = vector.broadcast %cst_6 : f32 to vector<16x128xf32>
    %14 = arith.mulf %12, %13 : vector<16x128xf32>
    %15 = math.exp %14 : vector<16x128xf32>
    %cst_7 = arith.constant dense<0.000000e+00> : vector<16xf32>
    %16 = vector.multi_reduction <add>, %15, %cst_7 [1] : vector<16x128xf32> to vector<16xf32>
    %17 = vector.shape_cast %16 : vector<16xf32> to vector<16x1xf32>
    %18 = math.log %17 : vector<16x1xf32>
    %cst_8 = arith.constant 1.000000e+00 : bf16
    %19 = vector.broadcast %cst_8 : bf16 to vector<128x1xbf16>
    %cst_9 = arith.constant dense<0.000000e+00> : vector<16x1xf32>
    %20 = tpu.matmul %6, %19, %cst_9 {dimension_numbers = #tpu.dot_dimension_numbers<[1], [0], [0], [1], [0, 0, 1, 1], [], []>} : vector<16x128xbf16>, vector<128x1xbf16>, vector<16x1xf32> -> vector<16x1xf32>
    %21 = arith.extf %6 : vector<16x128xbf16> to vector<16x128xf32>
    %22 = arith.mulf %21, %14 : vector<16x128xf32>
    %cst_10 = arith.constant dense<0.000000e+00> : vector<16xf32>
    %23 = vector.multi_reduction <add>, %22, %cst_10 [1] : vector<16x128xf32> to vector<16xf32>
    %24 = vector.shape_cast %23 : vector<16xf32> to vector<16x1xf32>
    %25 = arith.mulf %18, %20 : vector<16x1xf32>
    %26 = arith.subf %24, %25 : vector<16x1xf32>
    %c0_11 = arith.constant 0 : index
    %c0_12 = arith.constant 0 : index
    %c0_13 = arith.constant 0 : index
    %27 = vector.load %arg4[%c0_11, %c0_12, %c0_13] : memref<1x16x1xf32, #tpu.memory_space<vmem>>, vector<1x16x1xf32>
    %28 = vector.shape_cast %27 : vector<1x16x1xf32> to vector<16x1xf32>
    %29 = arith.mulf %26, %28 : vector<16x1xf32>
    %cst_14 = arith.constant dense<0.000000e+00> : vector<1xf32>
    %30 = vector.multi_reduction <add>, %29, %cst_14 [0] : vector<16x1xf32> to vector<1xf32>
    %31 = vector.shape_cast %30 : vector<1xf32> to vector<1x1xf32>
    %cst_15 = arith.constant dense<0.000000e+00> : vector<1xf32>
    %32 = vector.multi_reduction <add>, %28, %cst_15 [0] : vector<16x1xf32> to vector<1xf32>
    %33 = vector.shape_cast %32 : vector<1xf32> to vector<1x1xf32>
    %c0_16 = arith.constant 0 : index
    %c0_17 = arith.constant 0 : index
    %c0_18 = arith.constant 0 : index
    %34 = vector.load %arg5[%c0_16, %c0_17, %c0_18] : memref<1x1x2xf32, #tpu.memory_space<vmem>>, vector<1x1x1xf32>
    %35 = vector.shape_cast %34 : vector<1x1x1xf32> to vector<1x1xf32>
    %36 = arith.addf %35, %31 : vector<1x1xf32>
    %c0_19 = arith.constant 0 : index
    %c0_20 = arith.constant 0 : index
    %c0_21 = arith.constant 0 : index
    %37 = vector.load %arg5[%c0_19, %c0_20, %c0_21] : memref<1x1x2xf32, #tpu.memory_space<vmem>>, vector<1x1x1xf32>
    %38 = vector.shape_cast %37 : vector<1x1x1xf32> to vector<1x1xf32>
    %39 = vector.shape_cast %36 : vector<1x1xf32> to vector<1x1x1xf32>
    tpu.vector_store %arg5[%c0_19, %c0_20, %c0_21], %39 {strides = array<i32>} : memref<1x1x2xf32, #tpu.memory_space<vmem>>, vector<1x1x1xf32>,
    %c0_22 = arith.constant 0 : index
    %c0_23 = arith.constant 0 : index
    %c1 = arith.constant 1 : index
    %40 = vector.load %arg5[%c0_22, %c0_23, %c1] : memref<1x1x2xf32, #tpu.memory_space<vmem>>, vector<1x1x1xf32>
    %41 = vector.shape_cast %40 : vector<1x1x1xf32> to vector<1x1xf32>
    %42 = arith.addf %41, %33 : vector<1x1xf32>
    %c0_24 = arith.constant 0 : index
    %c0_25 = arith.constant 0 : index
    %c1_26 = arith.constant 1 : index
    %43 = vector.load %arg5[%c0_24, %c0_25, %c1_26] : memref<1x1x2xf32, #tpu.memory_space<vmem>>, vector<1x1x1xf32>
    %44 = vector.shape_cast %43 : vector<1x1x1xf32> to vector<1x1xf32>
    %45 = vector.shape_cast %42 : vector<1x1xf32> to vector<1x1x1xf32>
    tpu.vector_store %arg5[%c0_24, %c0_25, %c1_26], %45 {strides = array<i32>} : memref<1x1x2xf32, #tpu.memory_space<vmem>>, vector<1x1x1xf32>,
    return
  }
  func.func @transform_0(%arg0: i32, %arg1: i32) -> (i32, i32, i32) {
    %c0_i32 = arith.constant 0 : i32
    %c0_i32_0 = arith.constant 0 : i32
    return %arg0, %arg1, %c0_i32 : i32, i32, i32
  }
  func.func @transform_1(%arg0: i32, %arg1: i32) -> (i32, i32, i32) {
    %c0_i32 = arith.constant 0 : i32
    %c0_i32_0 = arith.constant 0 : i32
    return %arg0, %arg1, %c0_i32 : i32, i32, i32
  }
  func.func @transform_2(%arg0: i32, %arg1: i32) -> (i32, i32, i32) {
    %c0_i32 = arith.constant 0 : i32
    %c0_i32_0 = arith.constant 0 : i32
    return %arg0, %arg1, %c0_i32 : i32, i32, i32
  }
  func.func @transform_3(%arg0: i32, %arg1: i32) -> (i32, i32, i32) {
    %c0_i32 = arith.constant 0 : i32
    %c0_i32_0 = arith.constant 0 : i32
    %c0_i32_1 = arith.constant 0 : i32
    return %arg0, %c0_i32, %c0_i32_0 : i32, i32, i32
  }
}

</mosaic_0001>

<bundles_post_ra>
// kernel: tpu_custom_call.1
= control target key start
LH: loop header
LB: loop body
LE: loop exit
PB: predicated region body
PF: predicated region fallthrough
CT: control target
= control target key end

     0   :  { %8 = vsyncpa [#allocation3], 0  ;;  %s912_s0 = inlined_call_operand.vmem [shape: bf16[2,16,128], index: 0, kind: input, shape index: {}]   ;;  %s913_s1 = inlined_call_operand.vmem [shape: bf16[2,16,128], index: 1, kind: input, shape index: {}]   ;;  %s914_s2 = inlined_call_operand.vmem [shape: f32[2,16,1], index: 2, kind: input, shape index: {}]   ;;  %s915_s3 = inlined_call_operand.hbm [shape: f32[2,1,2], index: 3, kind: output, shape index: {}]  }
   0x1   :  { %10 = vsyncpa [#allocation3 + $0x1], 0  ;;  %s760_s12 = smov 0   ;;  %s762_s13 = smov 0  }
   0x2   :  { %s764_s14 = smov 0   ;;  %s766_s15 = smov 0  }
   0x3   :  { %s768_s16 = smov 0   ;;  %s770_s17 = smov 0  }
   0x4 LB: > { %s534_s18 = sadd.s32 4294967295, %s732_s17   ;;  %s535_s19 = sadd.s32 4294967294, %s732_s17   ;;  %s732_s17 = sphi %s770_s17, %s16_s17   ;;  %s728_s16 = sphi %s768_s16, %s922_s16   ;;  %s724_s15 = sphi %s766_s15, %s921_s15   ;;  %s720_s14 = sphi %s764_s14, %s920_s14   ;;  %s716_s13 = sphi %s762_s13, %s919_s13   ;;  %s712_s12 = sphi %s760_s12, %s918_s12  }
   0x5   : > { %s28_s20 = sadd.s32 1, %s728_s16  ;;  %s119_s21 = sadd.s32 1, %s720_s14 }
   0x6   : > { %p30_p0 = scmp.ge.s32.totalorder %s28_s20, 2  ;;  %p129_p1 = scmp.ne.s32.totalorder %s720_s14, %s716_s13 }
   0x7   : > { %p130_p2 = scmp.eq.s32.totalorder %s534_s18, 1  ;;  %p135_p3 = scmp.ne.s32.totalorder %s716_s13, %s712_s12 }
   0x8   : > { %s924_s20 = smov (%p30_p0, %s28_s20), 0  ;;  %p136_p5 = scmp.eq.s32.totalorder %s535_s19, 1 }
   0x9   : > { %p800_p4 = por %p130_p2, %p129_p1  ;;  %s116_s23 = ssub.s32 %s728_s16, %s924_s20 }
   0xa   : > { %p538_p6 = scmp.ge.s32.totalorder %s732_s17, 1  ;;  %p117_p7 = scmp.eq.s32.totalorder %s116_s23, 0 }
   0xb   : > { %p807_p8 = por %p136_p5, %p135_p3  ;;  %p193_p9 = scmp.lt.s32.totalorder %s732_s17, 3 }
   0xc   : > { %s813_s25 = scalar_select %p117_p7, %s720_s14, %s119_s21  }
   0xd   : > { %p194_p10 = pnand %p538_p6, %p193_p9 }
   0xe   : > { %p239_p11 = scmp.lt.s32.totalorder (!%p194_p10), %s724_s15, 1  ;;  %v734_v0 = vmov (!%p194_p10), 0.0   ;;  %vm735_vm0 = vmmov (!%p194_p10), 0   ;;  %v736_v1 = vmov (!%p194_p10), 1065369472   ;;  %vm371_vm1 = vcmask (!%p194_p10), 7168  }
   0xf   : > { %197 = sbr.rel (%p194_p10) target bundleno = 395 (0x18b), region = 32  ;;  %562 = vmatprep.subr.bf16.mxu0 (!%p194_p10), %v734_v0  ;;  %578 = vmatprep.mubr.msk.bf16.mxu0 (!%p194_p10), %vm735_vm0, %v734_v0  ;;  %v737_v30 = vmov (!%p194_p10), 1966171168   ;;  %v399_v32 = vlaneseq (!%p194_p10)  ;;  %s738_s11 = smov (!%p194_p10), 1   ;;  %vm274_vm2 = vcmask (!%p194_p10), 8192   ;;  %vm392_vm3 = vcmask (!%p194_p10), 0  }
  0x10   : > { %563 = vmatpush3.bf16.msra.mxu0 (!%p194_p10), %v736_v1  ;;  %v397_v31 = vunpack.c.l.s4 (!%p194_p10), %v737_v30  ;;  %s236_s18 = sand.u32 (!%p194_p10), 1, %s716_s13   ;;  %s547_s21 = sshll.u32 (!%p194_p10), %s724_s15, 4  ;;  %vm414_vm4 = vcmask (!%p194_p10), 8200  }
  0x11   : > { %564 = vmatprep.subr.bf16.mxu0 (!%p194_p10), %v734_v0  ;;  %v400_v35 = vshrl.u32 (!%p194_p10), %v399_v32, 7  ;;  %s846_s19 = scalar_lea.vmem (!%p194_p10), [#allocation2], %s236_s18  ;;  %s862_s28 = scalar_lea.hbm (!%p194_p10), %s915_s3, %s547_s21 }
  0x12   : > { %v398_v34 = vunpack.c.0.s8 (!%p194_p10), %v397_v31  ;;  %275 = vst.msk [vmem:[%s846_s19] sm:$0x1] (!%p194_p10), %vm274_vm2, %v734_v0  ;;  %s429_s23 = sshll.u32 (!%p194_p10), %s846_s19, 4  ;;  %s417_s29 = scalar_lea.sflag (!%p194_p10), [#allocation3], %s236_s18  ;;  %s864_s23 = int_to_ptr.vmem [resolvable:$true] %s429_s23 }
  0x14   : > { %565 = vmatpush3.bf16.msra.mxu0 (!%p194_p10), %v736_v1  ;;  %v401_v37 = vsub.s32 (!%p194_p10), %v398_v34, %v400_v35 }
  0x15   : > { %566 = vmatprep.subr.bf16.mxu0 (!%p194_p10), %v734_v0 }
  0x16   : > { %s240_s26 = scalar_select %p239_p11, %s724_s15, 1 }
  0x17   : > { %s739_s15 = smov [#allocation2]  }
  0x18   : > { %s550_s27 = sshll.u32 %s240_s26, 3  ;;  %567 = vmatpush3.bf16.msra.mxu0 %v736_v1  ;;  %s552_s7 = sshll.u32 %s240_s26, 4 }
  0x19   : > { %s246_s30 = scalar_lea.vmem %s912_s0, %s550_s27  ;;  %568 = vmatprep.subr.bf16.mxu0 %v734_v0  ;;  %s256_s6 = scalar_lea.vmem %s913_s1, %s550_s27 }
  0x1a   : > { %v276_v2 = vld [vmem:[%s246_s30] sm:$0xff]   ;;  %s266_s10 = scalar_lea.vmem %s914_s2, %s552_s7  ;;  %s654_s30 = scalar_lea.vmem %s864_s23, 16 }
  0x1b   : > { %286 = vmax.xlane.bf16.xlu0 %v276_v2  ;;  %v278_v3 = vld [vmem:[%s256_s6] sm:$0xff]   ;;  %v290_v4 = vunpack.c.l.bf16 %v276_v2  ;;  %v291_v5 = vunpack.c.h.bf16 %v276_v2  ;;  %v837_v7 = vld [vmem:[%s266_s10 + $0x8] sm:$0xff]  ;;  %p655_p12 = scmp.ne.s32.totalorder %s864_s23, %s654_s30  ;;  %s658_s4 = sshll.u32 %s739_s15, 4  ;;  %s659_s4 = int_to_ptr.vmem [resolvable:$false] %s658_s4 }
  0x1c   : > { %569 = vmatpush3.bf16.msra.mxu0 %v736_v1  ;;  %v835_v6 = vld [vmem:[%s266_s10] sm:$0xff]  ;;  %v382_v12 = vsel %vm371_vm1, %v837_v7, 0.0  ;;  %v355_v15 = vunpack.c.l.bf16 %v278_v3  ;;  %v356_v16 = vunpack.c.h.bf16 %v278_v3  ;;  %s660_s5 = scalar_lea.vmem %s659_s4, 32  ;;  %p661_p1 = scmp.lt.s32.totalorder %s864_s23, %s659_s4 }
  0x1d   : > { %570 = vmatprep.subr.bf16.mxu0 %v734_v0  ;;  %v381_v11 = vsel %vm371_vm1, %v835_v6, 0.0  ;;  %v390_v2 = vld [vmem:[%s846_s19] sm:$0x1]  ;;  %p656_p13 = pnand %p655_p12, %p800_p4  ;;  %p662_p2 = scmp.lt.s32.totalorder %s660_s5, %s654_s30 }
  0x1e   : > { %v383_v19 = vadd.f32 %v382_v12, %v381_v11 }
  0x1f   : > { %p657_p0 = pneg %p656_p13  ;;  %p663_p3 = por %p662_p2, %p661_p1 }
  0x20   : > { %571 = vmatpush3.bf16.msra.mxu0 %v736_v1  ;;  %v384_v24 = vrot.slane %v383_v19, 4 }
  0x21   : > { %572 = vmatprep.subr.bf16.mxu0 %v734_v0  ;;  %p664_p5 = pnand %p663_p3, %p657_p0 }
  0x22   : > { %v385_v25 = vadd.f32 %v384_v24, %v383_v19 }
  0x24   : > { %573 = vmatpush3.bf16.msra.mxu0 %v736_v1  ;;  %v386_v26 = vrot.slane %v385_v25, 2 }
  0x25   : > { %574 = vmatprep.subr.bf16.mxu0 %v734_v0 }
  0x26   : > { %v387_v29 = vadd.f32 %v386_v26, %v385_v25 }
  0x28   : > { %575 = vmatpush3.bf16.msra.mxu0 %v736_v1  ;;  %v388_v33 = vrot.slane %v387_v29, 1 }
  0x29   : > { %576 = vmatprep.subr.bf16.mxu0 %v734_v0 }
  0x2a   : > { %v389_v36 = vadd.f32 %v388_v33, %v387_v29 }
  0x2c   : > { %577 = vmatpush3.bf16.msra.mxu0 %v736_v1  ;;  %v402_v38 = vrot.slane %v389_v36, %v401_v37 }
  0x2e   : > { %v409_v39 = vrot.slane %v402_v38, %v401_v37 }
  0x2f   : > { %579 = vmatmul.mubr.bf16.vlgmr.msra.gmra.mrb[0].mxu0 %v278_v3 }
  0xac   : > { %v287_v8 = vpop.xlane.xlu0 %286 }
  0xad   : > { %v288_v9 = vunpack.c.l.bf16 %v287_v8  ;;  %v289_v10 = vunpack.c.h.bf16 %v287_v8 }
  0xaf   : > { %v292_v13 = vsub.f32 %v290_v4, %v288_v9  ;;  %v293_v14 = vsub.f32 %v291_v5, %v289_v10 }
  0xb1   : > { %v294_v17 = vmul.f32 10.0, %v292_v13  ;;  %v295_v18 = vmul.f32 10.0, %v293_v14 }
  0xb3   : > { %v296_v20 = vmul.f32 1.442695, %v294_v17  ;;  %v298_v21 = vmul.f32 1.442695, %v295_v18  ;;  %v357_v22 = vmul.f32 %v355_v15, %v294_v17  ;;  %v358_v23 = vmul.f32 %v356_v16, %v295_v18 }
  0xb5   : > { %646 = vpow2.f32 %v296_v20 }
  0xb6   : > { %648 = vpow2.f32 %v298_v21 }
  0xbf   : > { %v647_v27 = vpop.eup %646 }
  0xc0   : > { %v649_v28 = vpop.eup %648  ;;  %300 = vadd.xlane.f32.xlu0 %v647_v27 }
  0xc1   : > { %302 = vadd.xlane.f32.xlu1 %v649_v28 }
  0xc5   : > { %359 = vadd.xlane.f32.xlu1 %v357_v22 }
  0xc9   : > { %361 = vadd.xlane.f32.xlu1 %v358_v23 }
  0xd6   : > { %410 = vrot.lane.b32.xlu0 %v409_v39, %s738_s11 }
 0x102   : > { %v348_v40 = vpop.f32.mrb[0].mxu0 }
 0x103   : > { %v580_v41 = vpop.f32.mrb[1].mxu0 }
 0x104   : > { %v351_v42 = vpop.f32.mrb[2].mxu0 }
 0x105   : > { %v581_v43 = vpop.f32.mrb[3].mxu0 }
 0x14d   : > { %v301_v44 = vpop.xlane.xlu0 %300 }
 0x14e   : > { %v303_v45 = vpop.xlane.xlu1 %302  ;;  %650 = vlog2.f32 %v301_v44 }
 0x14f   : > { %652 = vlog2.f32 %v303_v45 }
 0x151   : > { %v411_v5 = vpop.permute.xlu0 %410 }
 0x152   : > { %v360_v46 = vpop.xlane.xlu1 %359 }
 0x156   : > { %v362_v54 = vpop.xlane.xlu1 %361 }
 0x158   : > { %v651_v47 = vpop.eup %650 }
 0x159   : > { %v653_v48 = vpop.eup %652  ;;  %v305_v49 = vmul.f32 0.6931472, %v651_v47 }
 0x15a   : > { %v307_v50 = vmul.f32 0.6931472, %v653_v48 }
 0x15b   : > { %v363_v51 = vmul.f32 %v348_v40, %v305_v49 }
 0x15c   : > { %v364_v52 = vmul.f32 %v351_v42, %v307_v50 }
 0x15d   : > { %v365_v53 = vsub.f32 %v360_v46, %v363_v51 }
 0x15e   : > { %v366_v55 = vsub.f32 %v362_v54, %v364_v52 }
 0x15f   : > { %v369_v56 = vmul.f32 %v835_v6, %v365_v53 }
 0x160   : > { %v370_v57 = vmul.f32 %v837_v7, %v366_v55 }
 0x161   : > { %v372_v58 = vsel %vm371_vm1, %v369_v56, 0.0 }
 0x162   : > { %v373_v59 = vsel %vm371_vm1, %v370_v57, 0.0 }
 0x163   : > { %v374_v60 = vadd.f32 %v373_v59, %v372_v58 }
 0x165   : > { %v375_v61 = vrot.slane %v374_v60, 4 }
 0x167   : > { %v376_v62 = vadd.f32 %v375_v61, %v374_v60 }
 0x169   : > { %v377_v63 = vrot.slane %v376_v62, 2 }
 0x16b   : > { %v378_v0 = vadd.f32 %v377_v63, %v376_v62 }
 0x16d   : > { %v379_v1 = vrot.slane %v378_v0, 1 }
 0x16f   : > { %v380_v3 = vadd.f32 %v379_v1, %v378_v0 }
 0x171   : > { %v391_v4 = vadd.f32 %v390_v2, %v380_v3 }
 0x173   : > { %393 = vst.msk [vmem:[%s846_s19] sm:$0x1] %vm392_vm3, %v391_v4 }
 0x17a   : > { %v394_v6 = vld [vmem:[%s846_s19] sm:$0x1] }
 0x17b   : > { %v413_v7 = vadd.f32 %v411_v5, %v394_v6 }
 0x17d   : > { %415 = vst.msk [vmem:[%s846_s19] sm:$0x1] %vm414_vm4, %v413_v7 }
 0x17e   : > { %667 = shalt.err (!%p664_p5)
}
 0x17f   : > { %s668_s6 = scalar_lea.hbm %s862_s28, 16  ;;  %s672_s9 = scalar_lea.hbm %s915_s3, 32 }
 0x180   : > { %p669_p6 = scmp.ne.s32.totalorder %s862_s28, %s668_s6  ;;  %p673_p10 = scmp.lt.u32.totalorder %s862_s28, %s915_s3 }
 0x181   : > { %p674_p11 = scmp.lt.u32.totalorder %s672_s9, %s668_s6  ;;  %p676_p13 = scmp.lt.u32.totalorder %s668_s6, %s862_s28 }
 0x182   : > { %p670_p7 = pnand %p669_p6, %p800_p4 }
 0x183   : > { %p675_p12 = por %p674_p11, %p673_p10 }
 0x184   : > { %p671_p9 = pneg %p670_p7 }
 0x185   : > { %p677_p0 = por %p676_p13, %p675_p12 }
 0x187   : > { %p678_p1 = pnand %p677_p0, %p671_p9 }
 0x189   : > { %681 = shalt.err (!%p678_p1)
}
 0x18a   : > { %582 = dma.vmem_to_hbm [thread:$0]  (%p800_p4), %s864_s23, 16, %s862_s28, %s417_s29  }
 0x18b PF: > { %p588_p2 = scmp.ge.s32.totalorder %s732_s17, 2  ;;  %s441_s18 = sand.u32 1, %s712_s12  }
 0x18c   : > { %s442_s19 = scalar_lea.sflag [#allocation3], %s441_s18 }
 0x18d   : > { %p585_p3 = pnand %p588_p2, %p807_p8 }
 0x18f   : > { %707 = dma.done.wait (!%p585_p3), %s442_s19, 16  }
 0x190   : > { %709 = vsyncadd (!%p585_p3), %s442_s19, 4294967280  ;;  %s16_s17 = sadd.s32 1, %s732_s17   ;;  %s918_s12 = smov %s716_s13 }
 0x191   : > { %p13_p5 = scmp.ge.s32.totalorder %s16_s17, 4   ;;  %s919_s13 = smov %s720_s14 }
 0x192   : > { %s920_s14 = smov %s813_s25  ;;  %s921_s15 = smov %s728_s16 }
 0x193   : > { %s922_s16 = smov %s924_s20  ;;  %15 = sbr.rel (!%p13_p5) target bundleno = 4 (0x4), region = 77 }
 0x19a   :  { %446 = vsyncpa [#allocation3], 1 }
 0x19b   :  { %448 = vsyncpa [#allocation3 + $0x1], 1 }

</bundles_post_ra>
